<compile_context>
chip_gen: v7x
topology: tpu7x:2x2x1
jax: 0.10.0
libtpu: 0.0.40
codegen_flags: <defaults>
</compile_context>

<pallas_src>
import jax
import jax.numpy as jnp
from jax import lax
from jax.experimental import pallas as pl
from jax.experimental.pallas import tpu as pltpu


_ONEHOT_VOCAB_LIMIT = 2048     # one-hot (TM,vocab)@V MXU gather stays cheap below this
_VMEM_V_BYTES_LIMIT = 8 << 20  # keep a resident V comfortably inside v7x's VMEM budget
_MAX_IDS_PER_CALL = 32768      # scalar-prefetched ids stay ~128 KiB in SMEM per call


def _round_up(x, m):
    return ((x + m - 1) // m) * m


def _pick_tm(n):
    """Token-block size: 512 on 128-MiB-VMEM chips (v5e/v6e), 256 on v7x (64 MiB)."""
    tm = 256
    try:
        info = pltpu.get_tpu_info()
        if getattr(info, "vmem_capacity_bytes", 0) >= (100 << 20):
            tm = 512
    except Exception:
        pass
    if n < tm:
        tm = max(16, _round_up(n, 16))  # multiple of 16 so TM/2 half-chunks stay 8-aligned
    return tm


def _vmem_limit(est_bytes):
    # Explicit scoped-VMEM limit with headroom (v5e default is only 16 MiB);
    # clamp below v7x's 64-MiB physical VMEM per TensorCore.
    return int(min(max(est_bytes + (2 << 20), 16 << 20), 60 << 20))


# ---------------------------------------------------------------------------
# Fast path: V (and U) resident in VMEM, one-hot MXU gather, no manual DMA.
# ---------------------------------------------------------------------------
def _vmem_v_body(ids_ref, v_ref, mask_ref, u_ref, out_ref):
    # ids_ref : VMEM (TM, 1) int32      token ids for this block
    # v_ref   : VMEM (vocab_pad, C)     full V, resident (constant block index)
    # mask_ref: VMEM (TM, C) or None    original/narrow dtype, upcast in-kernel
    # u_ref   : VMEM (C, D)             full U, resident
    # out_ref : VMEM (TM, D)
    tm = out_ref.shape[0]
    vocab = v_ref.shape[0]
    ids = ids_ref[...]
    # One-hot MXU gather: rows = onehot(ids) @ V (exact: 1.0/0.0 weights).
    onehot = (ids == lax.broadcasted_iota(jnp.int32, (tm, vocab), 1)).astype(v_ref.dtype)
    rows = jnp.dot(onehot, v_ref[...], preferred_element_type=jnp.float32)
    if mask_ref is not None:
        rows = rows * mask_ref[...].astype(rows.dtype)  # free VPU upcast of narrow mask
    out_ref[...] = jnp.dot(
        rows.astype(v_ref.dtype), u_ref[...], preferred_element_type=jnp.float32
    ).astype(out_ref.dtype)


def _vmem_kernel_masked(ids_ref, v_ref, mask_ref, u_ref, out_ref):
    _vmem_v_body(ids_ref, v_ref, mask_ref, u_ref, out_ref)


def _vmem_kernel_nomask(ids_ref, v_ref, u_ref, out_ref):
    _vmem_v_body(ids_ref, v_ref, None, u_ref, out_ref)


def _forward_vmem_v(ids, V, U, mask_flat, tm):
    (n,) = ids.shape
    vocab, c = V.shape
    d = U.shape[1]
    n_pad = _round_up(n, tm)
    nb = n_pad // tm

    if n_pad != n:
        ids = jnp.pad(ids, (0, n_pad - n))  # token 0: padded rows are sliced off below
        if mask_flat is not None:
            mask_flat = jnp.pad(mask_flat, ((0, n_pad - n), (0, 0)))

    # Pad vocab to a lane multiple so the one-hot contraction is MXU-tile clean.
    vocab_pad = _round_up(vocab, 128)
    v_p = V if vocab_pad == vocab else jnp.pad(V, ((0, vocab_pad - vocab), (0, 0)))
    ids2d = ids.reshape(n_pad, 1)

    has_mask = mask_flat is not None
    in_specs = [
        pl.BlockSpec((tm, 1), lambda i: (i, 0)),             # token ids
        pl.BlockSpec((vocab_pad, c), lambda i: (0, 0)),      # V, resident every step
    ]
    args = [ids2d, v_p]
    if has_mask:
        in_specs.append(pl.BlockSpec((tm, c), lambda i: (i, 0)))
        args.append(mask_flat)
    # TODO(synk): tile U along D ((C, TN) blocks on a 2nd grid axis, Buffered(1))
    # when C*D*4 approaches the v7x 32-MiB scoped-VMEM budget.
    in_specs.append(pl.BlockSpec((c, d), lambda i: (0, 0)))  # U, resident every step
    args.append(U)

    mask_bytes = mask_flat.dtype.itemsize if has_mask else 0
    vmem_est = (2 * vocab_pad * c * V.dtype.itemsize          # V blocks
                + 2 * c * d * U.dtype.itemsize                # U blocks
                + 2 * tm * 128 * 4                            # ids tiles (lane-padded)
                + 2 * tm * c * mask_bytes                     # mask blocks
                + 2 * tm * d * 4                              # out blocks
                + tm * vocab_pad * 4 + tm * c * 4)            # one-hot + rows temporaries

    kernel = _vmem_kernel_masked if has_mask else _vmem_kernel_nomask
    out = pl.pallas_call(
        kernel,
        out_shape=jax.ShapeDtypeStruct((n_pad, d), V.dtype),
        grid_spec=pltpu.PrefetchScalarGridSpec(
            num_scalar_prefetch=0,
            grid=(nb,),
            in_specs=in_specs,
            # TODO(synk): a lane-dense (TM*D//128, 128) output view when D < 128 would
            # avoid masked vst.msk stores; skipped (in-kernel relayout is shape-fragile).
            out_specs=pl.BlockSpec((tm, d), lambda i: (i, 0)),
        ),
        compiler_params=pltpu.CompilerParams(
            dimension_semantics=("parallel",),   # self-contained steps: v7x 2-TC sharding OK
            vmem_limit_bytes=_vmem_limit(vmem_est),
        ),
    )(*args)
    return out[:n]


# ---------------------------------------------------------------------------
# Large-vocab fallback: V in HBM, manual within-step double-buffered row gather.
# ---------------------------------------------------------------------------
def _hbm_gather_body(ids_ref, v_hbm, mask_ref, u_ref, out_ref, vbuf, sem):
    # ids_ref : SMEM (n_pad,) int32     scalar-prefetched token ids
    # v_hbm   : ANY  (vocab, C)         raw HBM ref, rows gathered manually
    # mask_ref: VMEM (TM, C) or None
    # u_ref   : VMEM (C, D)
    # out_ref : VMEM (TM, D)
    # vbuf    : VMEM (2, TM//2, C)      within-step half-chunk double buffer
    # sem     : DMA semaphores (2,)     one per half-chunk
    tm = out_ref.shape[0]
    th = vbuf.shape[1]
    base = pl.multiple_of(pl.program_id(0) * tm, tm)

    def issue(chunk):
        off = base + chunk * th

        def body(t, carry):
            tok = ids_ref[off + t]
            pltpu.make_async_copy(v_hbm.at[tok], vbuf.at[chunk, t], sem.at[chunk]).start()
            return carry

        lax.fori_loop(0, th, body, 0, unroll=min(th, 16))

    # Issue BOTH half-chunks' row gathers up-front: the second half's HBM
    # latency hides behind the first half's wait + matmul.
    issue(0)
    issue(1)

    u = u_ref[...]
    for chunk in range(2):  # static Python loop
        # ONE coalesced wait per half-chunk: the descriptor's size (TH rows of
        # C elements) equals the sum of the TH identical row copies signaled
        # on sem[chunk], so a single wait drains them exactly.
        pltpu.make_async_copy(
            v_hbm.at[pl.ds(0, th)], vbuf.at[chunk], sem.at[chunk]
        ).wait()
        rows = vbuf[chunk]
        if mask_ref is not None:
            rows = rows * mask_ref[chunk * th:(chunk + 1) * th, :].astype(rows.dtype)
        out_ref[chunk * th:(chunk + 1) * th, :] = jnp.dot(
            rows, u, preferred_element_type=jnp.float32
        ).astype(out_ref.dtype)


def _hbm_kernel_masked(ids_ref, v_hbm, mask_ref, u_ref, out_ref, vbuf, sem):
    _hbm_gather_body(ids_ref, v_hbm, mask_ref, u_ref, out_ref, vbuf, sem)


def _hbm_kernel_nomask(ids_ref, v_hbm, u_ref, out_ref, vbuf, sem):
    _hbm_gather_body(ids_ref, v_hbm, None, u_ref, out_ref, vbuf, sem)


def _hbm_gather_call(ids, V, U, mask_flat, tm):
    (n,) = ids.shape
    vocab, c = V.shape
    d = U.shape[1]
    n_pad = _round_up(n, tm)
    nb = n_pad // tm
    th = tm // 2

    if n_pad != n:
        ids = jnp.pad(ids, (0, n_pad - n))  # pad with token 0 (safe gather, rows dropped)
        if mask_flat is not None:
            mask_flat = jnp.pad(mask_flat, ((0, n_pad - n), (0, 0)))

    has_mask = mask_flat is not None
    in_specs = [pl.BlockSpec(memory_space=pl.ANY)]  # V stays in HBM
    args = [ids, V]
    if has_mask:
        in_specs.append(pl.BlockSpec((tm, c), lambda i, ids_ref: (i, 0)))
        args.append(mask_flat)
    in_specs.append(pl.BlockSpec((c, d), lambda i, ids_ref: (0, 0)))
    args.append(U)

    mask_bytes = mask_flat.dtype.itemsize if has_mask else 0
    vmem_est = (2 * th * c * V.dtype.itemsize        # gather double buffer
                + 2 * c * d * U.dtype.itemsize
                + 2 * tm * c * mask_bytes
                + 2 * tm * d * 4
                + tm * c * 4)

    kernel = _hbm_kernel_masked if has_mask else _hbm_kernel_nomask
    out = pl.pallas_call(
        kernel,
        out_shape=jax.ShapeDtypeStruct((n_pad, d), V.dtype),
        grid_spec=pltpu.PrefetchScalarGridSpec(
            num_scalar_prefetch=1,                   # ids -> SMEM
            grid=(nb,),
            in_specs=in_specs,
            out_specs=pl.BlockSpec((tm, d), lambda i, ids_ref: (i, 0)),
            scratch_shapes=[
                pltpu.VMEM((2, th, c), V.dtype),     # within-step half-chunk double buffer
                pltpu.SemaphoreType.DMA((2,)),
            ],
        ),
        compiler_params=pltpu.CompilerParams(
            dimension_semantics=("parallel",),       # steps are self-contained (v7x 2 TCs)
            vmem_limit_bytes=_vmem_limit(vmem_est),
        ),
    )(*args)
    return out[:n]


def _forward_hbm_gather(ids, V, U, mask_flat, tm):
    """Large-vocab fallback; wrapper-chunked so scalar-prefetched ids fit SMEM."""
    (n,) = ids.shape
    outs = []
    for s in range(0, n, _MAX_IDS_PER_CALL):
        e = min(s + _MAX_IDS_PER_CALL, n)
        m = None if mask_flat is None else mask_flat[s:e]
        outs.append(_hbm_gather_call(ids[s:e], V, U, m, tm))
    return outs[0] if len(outs) == 1 else jnp.concatenate(outs, axis=0)


# ---------------------------------------------------------------------------
# Public wrapper
# ---------------------------------------------------------------------------
def embedding_component_forward(x, V, U, mask=None, *, force_hbm_gather=False):
    """Pallas implementation of EmbeddingComponent.forward.

      out[b, p] = (V[x[b, p]] * mask[b, p]) @ U        (mask optional)

    Args:
      x:    int token ids, [batch, pos]
      V:    [vocab_size, C]
      U:    [C, embedding_dim]
      mask: optional [batch, pos, C] (any float dtype; streamed as-is, upcast in-kernel)
      force_hbm_gather: testing switch to exercise the large-vocab fallback path.
    Returns:
      [batch, pos, embedding_dim] in V.dtype
    """
    b, p = x.shape
    vocab, c = V.shape
    c2, d = U.shape
    assert c == c2, "V and U disagree on C"
    n = b * p

    ids = x.reshape(n).astype(jnp.int32)
    mask_flat = None
    if mask is not None:
        mask_flat = mask.reshape(n, c)
        if mask_flat.dtype == jnp.bool_:
            # i1 VMEM blocks are fragile; bf16 keeps the stream narrow (2 B/elem).
            mask_flat = mask_flat.astype(jnp.bfloat16)

    tm = _pick_tm(n)

    # TODO(synk): a bf16 V (+ bf16 vbuf) would halve gather bytes on the HBM path,
    # but changes numerics vs. the f32 reference, so it is not applied here.
    use_vmem_v = (
        not force_hbm_gather
        and vocab <= _ONEHOT_VOCAB_LIMIT
        and vocab * c * V.dtype.itemsize <= _VMEM_V_BYTES_LIMIT
    )
    # TODO(synk): mid-size vocabs (> one-hot limit but still VMEM-sized) would be
    # better served by a dynamic in-VMEM row gather than either path below.

    if use_vmem_v:
        out_flat = _forward_vmem_v(ids, V, U, mask_flat, tm)
    else:
        out_flat = _forward_hbm_gather(ids, V, U, mask_flat, tm)

    return out_flat.reshape(b, p, d)


if __name__ == "__main__":
    # Small, deterministic setup consistent with the module's __init__ shapes.
    vocab_size, C, embedding_dim = 50, 32, 64
    batch, pos = 2, 8

    key = jax.random.PRNGKey(0)
    kV, kU, kx, km = jax.random.split(key, 4)

    # Deterministic stand-in for init_param_ (fan-scaled normal).
    V = jax.random.normal(kV, (vocab_size, C), dtype=jnp.float32) / jnp.sqrt(
        float(embedding_dim))
    U = jax.random.normal(kU, (C, embedding_dim), dtype=jnp.float32) / jnp.sqrt(float(C))
    x = jax.random.randint(kx, (batch, pos), 0, vocab_size, dtype=jnp.int32)
    mask = (jax.random.uniform(km, (batch, pos, C)) > 0.5).astype(jnp.float32)

    ref = jnp.einsum("bpc,cd->bpd", V[x], U)
    ref_m = jnp.einsum("bpc,cd->bpd", V[x] * mask, U)

    # Tolerances absorb TPU default-precision (bf16-input) matmuls on either side;
    # genuine gather/mask bugs would show up as O(1e-1) errors.
    atol, rtol = 2e-3, 2e-2

    # 1) VMEM-resident-V fast path (one-hot MXU gather), no mask.
    out = jax.block_until_ready(embedding_component_forward(x, V, U, mask=None))
    assert out.shape == (batch, pos, embedding_dim)
    assert jnp.allclose(out, ref, atol=atol, rtol=rtol)

    # 2) VMEM-resident-V fast path, with mask.
    out_m = jax.block_until_ready(embedding_component_forward(x, V, U, mask=mask))
    assert jnp.allclose(out_m, ref_m, atol=atol, rtol=rtol)

    # 3) Large-vocab fallback (manual HBM row gather), forced here to exercise it.
    out_h = jax.block_until_ready(
        embedding_component_forward(x, V, U, mask=None, force_hbm_gather=True))
    assert jnp.allclose(out_h, ref, atol=atol, rtol=rtol)

    # 4) Large-vocab fallback, with mask.
    out_hm = jax.block_until_ready(
        embedding_component_forward(x, V, U, mask=mask, force_hbm_gather=True))
    assert jnp.allclose(out_hm, ref_m, atol=atol, rtol=rtol)

    print("KERNEL_OK")
</pallas_src>

<mosaic_0001>
module attributes {stable_mosaic.version = 11 : i64} {
  func.func @_vmem_kernel_nomask(%arg0: i32, %arg1: memref<16x1xi32, #tpu.memory_space<vmem>>, %arg2: memref<128x32xf32, #tpu.memory_space<vmem>>, %arg3: memref<32x64xf32, #tpu.memory_space<vmem>>, %arg4: memref<16x64xf32, #tpu.memory_space<vmem>>) attributes {dimension_semantics = [#tpu.dimension_semantics<parallel>], iteration_bounds = array<i64: 1>, scalar_prefetch = 0 : i64, scratch_operands = 0 : i64, tpu.core_type = #tpu.core_type<tc>, window_params = [{transform_indices = @transform_0, window_bounds = array<i64: 16, 1>}, {pipeline_mode = #tpu.pipeline_mode<synchronous>, transform_indices = @transform_1, window_bounds = array<i64: 128, 32>}, {pipeline_mode = #tpu.pipeline_mode<synchronous>, transform_indices = @transform_2, window_bounds = array<i64: 32, 64>}, {transform_indices = @transform_3, window_bounds = array<i64: 16, 64>}]} {
    %c0 = arith.constant 0 : index
    %c0_0 = arith.constant 0 : index
    %0 = vector.load %arg1[%c0, %c0_0] : memref<16x1xi32, #tpu.memory_space<vmem>>, vector<16x1xi32>
    %1 = tpu.iota {dimensions = array<i32: 1>} : vector<16x128xi32>
    %2 = vector.broadcast %0 : vector<16x1xi32> to vector<16x128xi32>
    %3 = arith.cmpi eq, %2, %1 : vector<16x128xi32>
    %4 = arith.extui %3 : vector<16x128xi1> to vector<16x128xi32>
    %5 = arith.sitofp %4 : vector<16x128xi32> to vector<16x128xf32>
    %c0_1 = arith.constant 0 : index
    %c0_2 = arith.constant 0 : index
    %6 = vector.load %arg2[%c0_1, %c0_2] : memref<128x32xf32, #tpu.memory_space<vmem>>, vector<128x32xf32>
    %cst = arith.constant dense<0.000000e+00> : vector<16x32xf32>
    %7 = tpu.matmul %5, %6, %cst {dimension_numbers = #tpu.dot_dimension_numbers<[1], [0], [0], [1], [0, 0, 1, 1], [], []>} : vector<16x128xf32>, vector<128x32xf32>, vector<16x32xf32> -> vector<16x32xf32>
    %c0_3 = arith.constant 0 : index
    %c0_4 = arith.constant 0 : index
    %8 = vector.load %arg3[%c0_3, %c0_4] : memref<32x64xf32, #tpu.memory_space<vmem>>, vector<32x64xf32>
    %cst_5 = arith.constant dense<0.000000e+00> : vector<16x64xf32>
    %9 = tpu.matmul %7, %8, %cst_5 {dimension_numbers = #tpu.dot_dimension_numbers<[1], [0], [0], [1], [0, 0, 1, 1], [], []>} : vector<16x32xf32>, vector<32x64xf32>, vector<16x64xf32> -> vector<16x64xf32>
    %c0_6 = arith.constant 0 : index
    %c0_7 = arith.constant 0 : index
    %10 = vector.load %arg4[%c0_6, %c0_7] : memref<16x64xf32, #tpu.memory_space<vmem>>, vector<16x64xf32>
    tpu.vector_store %arg4[%c0_6, %c0_7], %9 {strides = array<i32>} : memref<16x64xf32, #tpu.memory_space<vmem>>, vector<16x64xf32>,
    return
  }
  func.func @transform_0(%arg0: i32) -> (i32, i32) {
    %c0_i32 = arith.constant 0 : i32
    %c0_i32_0 = arith.constant 0 : i32
    return %arg0, %c0_i32 : i32, i32
  }
  func.func @transform_1(%arg0: i32) -> (i32, i32) {
    %c0_i32 = arith.constant 0 : i32
    %c0_i32_0 = arith.constant 0 : i32
    %c0_i32_1 = arith.constant 0 : i32
    return %c0_i32, %c0_i32_0 : i32, i32
  }
  func.func @transform_2(%arg0: i32) -> (i32, i32) {
    %c0_i32 = arith.constant 0 : i32
    %c0_i32_0 = arith.constant 0 : i32
    %c0_i32_1 = arith.constant 0 : i32
    return %c0_i32, %c0_i32_0 : i32, i32
  }
  func.func @transform_3(%arg0: i32) -> (i32, i32) {
    %c0_i32 = arith.constant 0 : i32
    %c0_i32_0 = arith.constant 0 : i32
    return %arg0, %c0_i32 : i32, i32
  }
}

</mosaic_0001>

<bundles_post_ra>
// kernel: tpu_custom_call.1
= control target key start
LH: loop header
LB: loop body
LE: loop exit
PB: predicated region body
PF: predicated region fallthrough
CT: control target
= control target key end

     0   :  { %v373_v2 = vmov 0   ;;  %s476_s0 = inlined_call_operand.vmem [shape: s32[16,1], index: 0, kind: input, shape index: {}]   ;;  %s477_s1 = inlined_call_operand.vmem [shape: f32[128,32], index: 1, kind: input, shape index: {}]   ;;  %s478_s2 = inlined_call_operand.vmem [shape: f32[32,64], index: 2, kind: input, shape index: {}]   ;;  %s479_s3 = inlined_call_operand.hbm [shape: f32[16,64], index: 3, kind: output, shape index: {}]  }
   0x1   :  { %v15_v0 = vld [vmem:[%s476_s0] sm:$0xff]  ;;  %348 = vset.pattern.permute.xlu0 %v373_v2  ;;  %v32_v3 = vld [vmem:[%s477_s1 + $0x8] sm:$0xff]  ;;  %v33_v4 = vld [vmem:[%s477_s1 + $0x10] sm:$0xff] }
   0x2   :  { %v31_v1 = vld [vmem:[%s477_s1] sm:$0xff]  ;;  %v34_v5 = vld [vmem:[%s477_s1 + $0x18] sm:$0xff]  ;;  %20 = vperm.xlu0 %348, %v15_v0   ;;  %v16_v8 = vld [vmem:[%s476_s0 + $0x8] sm:$0xff] }
   0x3   :  { %v303_v6 = vpack.c.bf16 %v32_v3, %v31_v1  ;;  %v307_v7 = vpack.c.bf16 %v34_v5, %v33_v4  ;;  %v35_v9 = vld [vmem:[%s477_s1 + $0x20] sm:$0xff]  ;;  %v36_v10 = vld [vmem:[%s477_s1 + $0x28] sm:$0xff]  ;;  %v37_v12 = vld [vmem:[%s477_s1 + $0x30] sm:$0xff] }
   0x4   :  { %v311_v11 = vpack.c.bf16 %v36_v10, %v35_v9  ;;  %v38_v13 = vld [vmem:[%s477_s1 + $0x38] sm:$0xff] }
   0x5   :  { %304 = vmatprep.subr.bf16.mxu0 %v303_v6 }
   0x6   :  { %306 = vmatpush3.bf16.msra.mxu0 %v303_v6  ;;  %23 = vperm.xlu0 %348, %v16_v8  }
   0x7   :  { %308 = vmatprep.subr.bf16.mxu0 %v307_v7 }
   0x8   :  { %8 = vsyncpa [#allocation3], 0  ;;  %v122_v14 = vld [vmem:[%s478_s2] sm:$0xff]  ;;  %v123_v15 = vld [vmem:[%s478_s2 + $0x8] sm:$0xff]  ;;  %v315_v20 = vpack.c.bf16 %v38_v13, %v37_v12  ;;  %v17_v33 = vlaneseq  ;;  %v374_v36 = vmov 1.0   ;;  %vm126_vm2 = vcmask 261120  }
   0x9   :  { %v124_v16 = vld [vmem:[%s478_s2 + $0x10] sm:$0xff]  ;;  %v335_v17 = vpack.c.bf16 %v123_v15, %v122_v14  ;;  %v125_v18 = vld [vmem:[%s478_s2 + $0x18] sm:$0xff]  ;;  %v39_v21 = vld [vmem:[%s477_s1 + $0x40] sm:$0xff]  ;;  %vm208_vm3 = vcmask 523264  }
   0xa   :  { %310 = vmatpush3.bf16.msra.mxu0 %v307_v7  ;;  %v339_v19 = vpack.c.bf16 %v125_v18, %v124_v16  ;;  %v40_v22 = vld [vmem:[%s477_s1 + $0x48] sm:$0xff]  ;;  %v41_v24 = vld [vmem:[%s477_s1 + $0x50] sm:$0xff]  ;;  %v42_v25 = vld [vmem:[%s477_s1 + $0x58] sm:$0xff]  ;;  %v18_v34 = vand.u32 127, %v17_v33 }
   0xb   :  { %312 = vmatprep.subr.bf16.mxu0 %v311_v11  ;;  %336 = vmatprep.subr.bf16.mxu1 %v335_v17  ;;  %v319_v23 = vpack.c.bf16 %v40_v22, %v39_v21  ;;  %v323_v26 = vpack.c.bf16 %v42_v25, %v41_v24  ;;  %v43_v27 = vld [vmem:[%s477_s1 + $0x60] sm:$0xff]  ;;  %v44_v28 = vld [vmem:[%s477_s1 + $0x68] sm:$0xff]  ;;  %v45_v30 = vld [vmem:[%s477_s1 + $0x70] sm:$0xff] }
   0xc   :  { %338 = vmatpush3.bf16.msra.mxu1 %v335_v17  ;;  %v327_v29 = vpack.c.bf16 %v44_v28, %v43_v27  ;;  %v46_v31 = vld [vmem:[%s477_s1 + $0x78] sm:$0xff]  ;;  %s375_s1 = smov [#allocation2]  }
   0xd   :  { %340 = vmatprep.subr.bf16.mxu1 %v339_v19  ;;  %v331_v32 = vpack.c.bf16 %v46_v31, %v45_v30  ;;  %s216_s27 = sshll.u32 %s375_s1, 4  ;;  %s217_s27 = int_to_ptr.vmem [resolvable:$true] %s216_s27 }
   0xe   :  { %314 = vmatpush3.bf16.msra.mxu0 %v311_v11  ;;  %s349_s28 = scalar_lea.vmem %s217_s27, 256  ;;  %p354_p1 = scmp.lt.s32.totalorder %s217_s27, %s217_s27 }
   0xf   :  { %316 = vmatprep.subr.bf16.mxu0 %v315_v20  ;;  %p350_p0 = scmp.ne.s32.totalorder %s217_s27, %s349_s28  ;;  %p355_p2 = scmp.lt.s32.totalorder %s349_s28, %s349_s28 }
  0x10   :  { %342 = vmatpush3.bf16.msra.mxu1 %v339_v19 }
  0x11   :  { %p356_p3 = por %p355_p2, %p354_p1 }
  0x12   :  { %318 = vmatpush3.bf16.msra.mxu0 %v315_v20 }
  0x13   :  { %320 = vmatprep.subr.bf16.mxu0 %v319_v23  ;;  %p357_p4 = pnand %p356_p3, %p350_p0 }
  0x16   :  { %322 = vmatpush3.bf16.msra.mxu0 %v319_v23 }
  0x17   :  { %324 = vmatprep.subr.bf16.mxu0 %v323_v26 }
  0x1a   :  { %326 = vmatpush3.bf16.msra.mxu0 %v323_v26 }
  0x1b   :  { %328 = vmatprep.subr.bf16.mxu0 %v327_v29 }
  0x1e   :  { %330 = vmatpush3.bf16.msra.mxu0 %v327_v29 }
  0x1f   :  { %332 = vmatprep.subr.bf16.mxu0 %v331_v32 }
  0x22   :  { %334 = vmatpush3.bf16.msra.mxu0 %v331_v32 }
  0x81   :  { %v21_v35 = vpop.permute.xlu0 %20 }
  0x82   :  { %vm25_vm0 = vcmp.eq.s32.totalorder %v21_v35, %v18_v34 }
  0x83   :  { %289 = vmatprep.mubr.msk.f32.mxu0 %vm25_vm0, %v374_v36 }
  0x85   :  { %v24_v37 = vpop.permute.xlu0 %23 }
  0x86   :  { %vm26_vm1 = vcmp.eq.s32.totalorder %v24_v37, %v18_v34 }
  0x87   :  { %290 = vmatmul.mubr.msk.f32.vlgmr.msra.gmra.mrb[0].mxu0 %vm26_vm1, %v374_v36 }
 0x15a   :  { %v291_v38 = vpop.f32.mrb[0].mxu0 }
 0x15b   :  { %v113_v39 = vpop.f32.mrb[1].mxu0 }
 0x15c   :  { %300 = vmatprep.mubr.msk.f32.mxu1 %vm126_vm2, %v113_v39 }
 0x15d   :  { %301 = vmatmul.mubr.msk.f32.vlgmr.msra.gmra.mrb[0].mxu1 %vm126_vm2, %v291_v38 }
 0x230   :  { %v302_v40 = vpop.f32.mrb[0].mxu1 }
 0x231   :  { %210 = vst.msk [vmem:[#allocation2 + $0x8] sm:$0xff] %vm208_vm3, %v302_v40  ;;  %v199_v41 = vpop.f32.mrb[1].mxu1 }
 0x232   :  { %209 = vst.msk [vmem:[#allocation2] sm:$0xff] %vm208_vm3, %v199_v41 }
 0x233   :  { %360 = shalt.err (!%p357_p4)
}
 0x234   :  { %s361_s4 = scalar_lea.hbm %s479_s3, 256 }
 0x235   :  { %p362_p5 = scmp.ne.s32.totalorder %s479_s3, %s361_s4  ;;  %p365_p6 = scmp.lt.u32.totalorder %s361_s4, %s479_s3 }
 0x237   :  { %p367_p7 = pnand %p365_p6, %p362_p5 }
 0x239   :  { %370 = shalt.err (!%p367_p7)
}
 0x23a   :  { %s376_s8 = smov 128   ;;  %s377_s9 = smov 8  }
 0x23b   :  { %222 = dma.vmem_to_hbm [thread:$0]  %s217_s27, 256, %s479_s3, [#allocation3], %s376_s8, %s376_s8, %s377_s9  }
 0x23c   :  { %371 = dma.done.wait [#allocation3], 256  }
 0x23d   :  { %372 = vsyncadd [#allocation3], 4294967040 }
 0x23e   :  { %226 = vsyncpa [#allocation3], 1 }

</bundles_post_ra>
